<compile_context>
chip_gen: v6e
topology: v6e:2x2x1
jax: 0.10.0
libtpu: 0.0.40
codegen_flags: <defaults>
</compile_context>

<pallas_src>
import jax
import jax.numpy as jnp
from jax.experimental import pallas as pl
from jax.experimental.pallas import tpu as pltpu

# Above the scoped defaults (16 MiB v5e / 32 MiB v6e,v7x) but comfortably under
# v7x's 64 MiB physical VMEM.
_VMEM_LIMIT_BYTES = 48 * 1024 * 1024


# --------------------------------------------------------------------------- #
# Kernel 1: uky = y @ Wy + by  (row-tiled, computed once)
# --------------------------------------------------------------------------- #
def _uky_kernel(y_ref, wy_ref, by_ref, o_ref):
    o_ref[...] = (jnp.dot(y_ref[...], wy_ref[...],
                          preferred_element_type=jnp.float32)
                  + by_ref[...]).astype(o_ref.dtype)


def _compute_uky(y, Wy, by, *, tm):
    N, in_size = y.shape
    out_size = Wy.shape[1]
    return pl.pallas_call(
        _uky_kernel,
        out_shape=jax.ShapeDtypeStruct((N, out_size), jnp.float32),
        grid_spec=pltpu.PrefetchScalarGridSpec(
            num_scalar_prefetch=0,
            grid=(N // tm,),
            in_specs=[
                pl.BlockSpec((tm, in_size), lambda i: (i, 0)),
                pl.BlockSpec((in_size, out_size), lambda i: (0, 0)),
                pl.BlockSpec((1, out_size), lambda i: (0, 0)),
            ],
            out_specs=pl.BlockSpec((tm, out_size), lambda i: (i, 0)),
        ),
        compiler_params=pltpu.CompilerParams(
            dimension_semantics=("parallel",),
            vmem_limit_bytes=_VMEM_LIMIT_BYTES),
    )(y, Wy, by)


# --------------------------------------------------------------------------- #
# Kernel 2: tiled AT @ uky with accumulator + fused Ukx / tau / ReLU epilogue
# --------------------------------------------------------------------------- #
def _pdhg_x_kernel(tau_ref, x_ref, tauc_ref, at_ref, uky_ref,
                   wx_ref, bx_ref, o_ref, acc_ref):
    k = pl.program_id(1)

    @pl.when(k == 0)
    def _():
        acc_ref[...] = jnp.zeros_like(acc_ref)

    # Tiled (AT @ Uky(y)) partial sum on the MXU, f32 accumulation.
    # (AT may be streamed as bf16 for HBM bandwidth; uky is matched to its dtype.)
    acc_ref[...] += jnp.dot(at_ref[...],
                            uky_ref[...].astype(at_ref.dtype),
                            preferred_element_type=jnp.float32)

    @pl.when(k == pl.num_programs(1) - 1)
    def _():
        # Epilogue runs once per row tile:
        #   out = ReLU( Ukx(x) + tau * (AT @ uky) - tau*c )
        ukx = jnp.dot(x_ref[...], wx_ref[...],
                      preferred_element_type=jnp.float32) + bx_ref[...]
        tau = tau_ref[0, 0]
        pre = ukx + tau * acc_ref[...] - tauc_ref[...]
        o_ref[...] = jnp.maximum(pre, 0.0).astype(o_ref.dtype)


def pdhg_layer_x_forward(x, y, AT, c, Wx, bx, Wy, by, tau, *,
                         tm=512, tk=1024, cast_at_bf16=False):
    """x,y: (N,in), AT: (N,N), c: (N,1), Wx/Wy: (in,out), bx/by: (1,out), tau: (1,).

    tm: row-tile (multiple of 8); tk: AT contraction tile (multiple of 128 or N).
    cast_at_bf16: stream AT as bf16 (halves the dominant HBM traffic), f32 accum.
    """
    N, in_size = x.shape
    out_size = Wx.shape[1]

    tm = min(tm, N)
    tk = min(tk, N)
    assert N % tm == 0 and N % tk == 0, "N must be divisible by tile sizes"
    assert tm % 8 == 0, "tm must be a multiple of 8"
    assert tk % 128 == 0 or tk == N, "tk must be a multiple of 128 (or equal N)"

    # Hoist Uky(y) out of the AT reduction loop: compute it once.
    uky = _compute_uky(y, Wy, by, tm=tm)

    # Scalars / small precomputes (tiny XLA ops).
    tau2d = jnp.asarray(tau, jnp.float32).reshape(1, 1)      # SMEM scalar
    tau_c = (tau2d * c).astype(jnp.float32)                   # (N, 1), replaces c @ ones

    at = AT.astype(jnp.bfloat16) if cast_at_bf16 else AT

    grid = (N // tm, N // tk)   # (row tiles, AT contraction tiles); reduction last.

    return pl.pallas_call(
        _pdhg_x_kernel,
        out_shape=jax.ShapeDtypeStruct((N, out_size), jnp.float32),
        grid_spec=pltpu.PrefetchScalarGridSpec(
            num_scalar_prefetch=0,
            grid=grid,
            in_specs=[
                pl.BlockSpec(memory_space=pltpu.MemorySpace.SMEM),        # tau (1,1)
                pl.BlockSpec((tm, in_size), lambda i, k: (i, 0)),          # x     (const in k)
                pl.BlockSpec((tm, 1), lambda i, k: (i, 0)),                # tau*c (const in k)
                pl.BlockSpec((tm, tk), lambda i, k: (i, k)),               # AT    (streamed)
                pl.BlockSpec((tk, out_size), lambda i, k: (k, 0)),         # uky
                pl.BlockSpec((in_size, out_size), lambda i, k: (0, 0)),    # Wx    (const)
                pl.BlockSpec((1, out_size), lambda i, k: (0, 0)),          # bx    (const)
            ],
            out_specs=pl.BlockSpec((tm, out_size), lambda i, k: (i, 0)),
            scratch_shapes=[pltpu.VMEM((tm, out_size), jnp.float32)],
        ),
        compiler_params=pltpu.CompilerParams(
            dimension_semantics=("parallel", "arbitrary"),
            vmem_limit_bytes=_VMEM_LIMIT_BYTES),
    )(tau2d, x, tau_c, at, uky, Wx, bx)


# --------------------------------------------------------------------------- #
# Pure-JAX reference mirroring the PyTorch forward
# --------------------------------------------------------------------------- #
def pdhg_layer_x_ref(x, y, AT, c, Wx, bx, Wy, by, tau):
    hi = jax.lax.Precision.HIGHEST
    ukx = jnp.dot(x, Wx, precision=hi) + bx
    uky = jnp.dot(y, Wy, precision=hi) + by
    one = jnp.ones((1, Wx.shape[1]), jnp.float32)
    return jnp.maximum(
        ukx - tau[0] * (jnp.dot(c, one, precision=hi) - jnp.dot(AT, uky, precision=hi)),
        0.0)


if __name__ == "__main__":
    # Small shapes consistent with the module's forward; big enough to exercise
    # the (row, contraction) tiling (grid = (2, 2)).
    N, in_size, out_size = 256, 64, 128
    tm, tk = 128, 128

    key = jax.random.PRNGKey(0)
    keys = jax.random.split(key, 9)

    x = jax.random.normal(keys[0], (N, in_size), jnp.float32)
    y = jax.random.normal(keys[1], (N, in_size), jnp.float32)
    AT_dense = jax.random.normal(keys[2], (N, N), jnp.float32)
    mask = (jax.random.uniform(keys[3], (N, N)) > 0.5).astype(jnp.float32)
    AT = AT_dense * mask                       # "sparse-ish" dense matrix
    c = jax.random.normal(keys[4], (N, 1), jnp.float32)

    # Deterministic parameter init (shapes from nn.Linear(in_size, out_size)).
    Wx = jax.random.normal(keys[5], (in_size, out_size), jnp.float32) * 0.1
    bx = jax.random.normal(keys[6], (1, out_size), jnp.float32) * 0.1
    Wy = jax.random.normal(keys[7], (in_size, out_size), jnp.float32) * 0.1
    by = jax.random.normal(keys[8], (1, out_size), jnp.float32) * 0.1
    tau = jnp.array([0.37], jnp.float32)

    ref = pdhg_layer_x_ref(x, y, AT, c, Wx, bx, Wy, by, tau)

    # f32 path (exact module semantics).
    out = pdhg_layer_x_forward(x, y, AT, c, Wx, bx, Wy, by, tau, tm=tm, tk=tk)
    out = jax.block_until_ready(out)
    assert out.shape == (N, out_size)
    assert jnp.allclose(out, ref, atol=2e-3, rtol=2e-3), "f32 kernel mismatch vs reference"

    # Bandwidth-optimized path: AT streamed as bf16, f32 MXU accumulation.
    out_bf16 = pdhg_layer_x_forward(x, y, AT, c, Wx, bx, Wy, by, tau,
                                    tm=tm, tk=tk, cast_at_bf16=True)
    out_bf16 = jax.block_until_ready(out_bf16)
    assert jnp.allclose(out_bf16, ref, atol=1e-1, rtol=1e-1), "bf16-AT kernel mismatch vs reference"

    print("KERNEL_OK")
</pallas_src>

<mosaic_0001>
module attributes {stable_mosaic.version = 11 : i64} {
  func.func @_uky_kernel(%arg0: i32, %arg1: memref<128x64xf32, #tpu.memory_space<vmem>>, %arg2: memref<64x128xf32, #tpu.memory_space<vmem>>, %arg3: memref<1x128xf32, #tpu.memory_space<vmem>>, %arg4: memref<128x128xf32, #tpu.memory_space<vmem>>) attributes {dimension_semantics = [#tpu.dimension_semantics<parallel>], iteration_bounds = array<i64: 2>, scalar_prefetch = 0 : i64, scratch_operands = 0 : i64, tpu.core_type = #tpu.core_type<tc>, window_params = [{transform_indices = @transform_0, window_bounds = array<i64: 128, 64>}, {pipeline_mode = #tpu.pipeline_mode<synchronous>, transform_indices = @transform_1, window_bounds = array<i64: 64, 128>}, {pipeline_mode = #tpu.pipeline_mode<synchronous>, transform_indices = @transform_2, window_bounds = array<i64: 1, 128>}, {transform_indices = @transform_3, window_bounds = array<i64: 128, 128>}]} {
    %c0 = arith.constant 0 : index
    %c0_0 = arith.constant 0 : index
    %0 = vector.load %arg1[%c0, %c0_0] : memref<128x64xf32, #tpu.memory_space<vmem>>, vector<128x64xf32>
    %c0_1 = arith.constant 0 : index
    %c0_2 = arith.constant 0 : index
    %1 = vector.load %arg2[%c0_1, %c0_2] : memref<64x128xf32, #tpu.memory_space<vmem>>, vector<64x128xf32>
    %cst = arith.constant dense<0.000000e+00> : vector<128x128xf32>
    %2 = tpu.matmul %0, %1, %cst {dimension_numbers = #tpu.dot_dimension_numbers<[1], [0], [0], [1], [0, 0, 1, 1], [], []>} : vector<128x64xf32>, vector<64x128xf32>, vector<128x128xf32> -> vector<128x128xf32>
    %c0_3 = arith.constant 0 : index
    %c0_4 = arith.constant 0 : index
    %3 = vector.load %arg3[%c0_3, %c0_4] : memref<1x128xf32, #tpu.memory_space<vmem>>, vector<1x128xf32>
    %4 = vector.broadcast %3 : vector<1x128xf32> to vector<128x128xf32>
    %5 = arith.addf %2, %4 : vector<128x128xf32>
    %c0_5 = arith.constant 0 : index
    %c0_6 = arith.constant 0 : index
    %6 = vector.load %arg4[%c0_5, %c0_6] : memref<128x128xf32, #tpu.memory_space<vmem>>, vector<128x128xf32>
    tpu.vector_store %arg4[%c0_5, %c0_6], %5 {strides = array<i32>} : memref<128x128xf32, #tpu.memory_space<vmem>>, vector<128x128xf32>,
    return
  }
  func.func @transform_0(%arg0: i32) -> (i32, i32) {
    %c0_i32 = arith.constant 0 : i32
    %c0_i32_0 = arith.constant 0 : i32
    return %arg0, %c0_i32 : i32, i32
  }
  func.func @transform_1(%arg0: i32) -> (i32, i32) {
    %c0_i32 = arith.constant 0 : i32
    %c0_i32_0 = arith.constant 0 : i32
    %c0_i32_1 = arith.constant 0 : i32
    return %c0_i32, %c0_i32_0 : i32, i32
  }
  func.func @transform_2(%arg0: i32) -> (i32, i32) {
    %c0_i32 = arith.constant 0 : i32
    %c0_i32_0 = arith.constant 0 : i32
    %c0_i32_1 = arith.constant 0 : i32
    return %c0_i32, %c0_i32_0 : i32, i32
  }
  func.func @transform_3(%arg0: i32) -> (i32, i32) {
    %c0_i32 = arith.constant 0 : i32
    %c0_i32_0 = arith.constant 0 : i32
    return %arg0, %c0_i32 : i32, i32
  }
}

</mosaic_0001>

<bundles_post_ra>
// kernel: tpu_custom_call.1
= control target key start
LH: loop header
LB: loop body
LE: loop exit
PB: predicated region body
PF: predicated region fallthrough
CT: control target
= control target key end

     0   :  { %8 = vsyncpa [#allocation3], 0  ;;  %s910_s0 = inlined_call_operand.vmem [shape: f32[256,64], index: 0, kind: input, shape index: {}]   ;;  %s911_s1 = inlined_call_operand.vmem [shape: f32[64,128], index: 1, kind: input, shape index: {}]   ;;  %s912_s2 = inlined_call_operand.vmem [shape: f32[1,128], index: 2, kind: input, shape index: {}]   ;;  %s913_s3 = inlined_call_operand.hbm [shape: f32[256,128], index: 3, kind: output, shape index: {}]  }
   0x1   :  { %10 = vsyncpa [#allocation3 + $0x1], 0  ;;  %s725_s12 = smov 0   ;;  %s727_s13 = smov 0  }
   0x2   :  { %s729_s14 = smov 0   ;;  %s731_s15 = smov 0  }
   0x3 LB: > { %s746_s16 = sadd.s32 4294967295, %s700_s15   ;;  %s489_s17 = sadd.s32 4294967294, %s700_s15   ;;  %s700_s15 = sphi %s731_s15, %s919_s15   ;;  %s696_s14 = sphi %s729_s14, %s918_s14   ;;  %s692_s13 = sphi %s727_s13, %s917_s13   ;;  %s688_s12 = sphi %s725_s12, %s916_s12  }
   0x4   : > { %s750_s18 = sadd.s32 1, %s700_s15   ;;  %s91_s19 = sadd.s32 1, %s696_s14 }
   0x5   : > { %s88_s20 = ssub.s32 %s700_s15, %s750_s18  ;;  %p101_p0 = scmp.ne.s32.totalorder %s696_s14, %s692_s13 }
   0x6   : > { %p89_p1 = scmp.eq.s32.totalorder %s88_s20, 0  ;;  %p102_p2 = scmp.eq.s32.totalorder %s746_s16, 1 }
   0x7   : > { %p107_p3 = scmp.ne.s32.totalorder %s692_s13, %s688_s12  ;;  %p108_p4 = scmp.eq.s32.totalorder %s489_s17, 1 }
   0x8   : > { %s761_s21 = scalar_select %p89_p1, %s696_s14, %s91_s19  }
   0x9   : > { %p763_p5 = por %p102_p2, %p101_p0  ;;  %p767_p6 = por %p108_p4, %p107_p3 }
   0xa   : > { %p492_p7 = scmp.ge.s32.totalorder %s700_s15, 1  ;;  %p141_p8 = scmp.lt.s32.totalorder %s700_s15, 3 }
   0xc   : > { %p142_p9 = pnand %p492_p7, %p141_p8 }
   0xd   : > { %s494_s28 = sshll.u32 (!%p142_p9), %s746_s16, 4  ;;  %s162_s27 = sand.u32 (!%p142_p9), 1, %s692_s13  }
   0xe   : > { %145 = sbr.rel (%p142_p9) target bundleno = 260 (0x104), region = 32  ;;  %p166_p10 = scmp.lt.s32.totalorder (!%p142_p9), %s494_s28, 31 }
   0xf   : > { %s518_s5 = sshll.u32 (!%p142_p9), %s746_s16, 11  ;;  %s870_s16 = scalar_lea.sflag (!%p142_p9), [#allocation3], %s162_s27 }
  0x10   : > { %s860_s9 = scalar_lea.hbm (!%p142_p9), %s913_s3, %s518_s5  ;;  %s702_s11 = smov (!%p142_p9), [#allocation2]  }
  0x11   : > { %s644_s17 = sshll.u32 (!%p142_p9), %s702_s11, 4  ;;  %s645_s17 = int_to_ptr.vmem [resolvable:$false] %s644_s17 }
  0x12   : > { %s646_s19 = scalar_lea.vmem (!%p142_p9), %s645_s17, 4096 }
  0x13   : > { %v195_v0 = vld [vmem:[%s911_s1 + $0x38] sm:$0xff]  ;;  %v194_v1 = vld [vmem:[%s911_s1 + $0x30] sm:$0xff]  ;;  %v193_v2 = vld [vmem:[%s911_s1 + $0x28] sm:$0xff]  ;;  %s921_s28 = smov (!%p166_p10, %s494_s28), 31  ;;  %vm203_vm0 = vcmask 523264  }
  0x14   : > { %543 = vmatprep.subr.mxu0 %v195_v0  ;;  %583 = vmatprep.subr.mxu1 %v195_v0  ;;  %v192_v3 = vld [vmem:[%s911_s1 + $0x20] sm:$0xff]  ;;  %v191_v4 = vld [vmem:[%s911_s1 + $0x18] sm:$0xff]  ;;  %v190_v5 = vld [vmem:[%s911_s1 + $0x10] sm:$0xff]  ;;  %s495_s10 = sshll.u32 %s921_s28, 3  ;;  %s493_s28 = sshll.u32 %s162_s27, 7 }
  0x15   : > { %544 = vmatpush3.msra.mxu0 %v195_v0  ;;  %591 = vmatpush3.msra.mxu1 %v195_v0  ;;  %v189_v6 = vld [vmem:[%s911_s1 + $0x8] sm:$0xff]  ;;  %s798_s24 = scalar_lea.vmem %s910_s0, %s495_s10  ;;  %v188_v7 = vld [vmem:[%s911_s1] sm:$0xff]  ;;  %s841_s4 = scalar_lea.vmem [#allocation2], %s493_s28 }
  0x16   : > { %545 = vmatprep.subr.mxu0 %v194_v1  ;;  %584 = vmatprep.subr.mxu1 %v194_v1  ;;  %v172_v8 = vld [vmem:[%s798_s24] sm:$0xff]  ;;  %v173_v10 = vld [vmem:[%s798_s24 + $0x8] sm:$0xff]  ;;  %v174_v12 = vld [vmem:[%s798_s24 + $0x10] sm:$0xff]  ;;  %s427_s6 = sshll.u32 %s841_s4, 4  ;;  %s862_s6 = int_to_ptr.vmem [resolvable:$true] %s427_s6 }
  0x17   : > { %546 = vmatpush3.msra.mxu0 %v194_v1  ;;  %592 = vmatpush3.msra.mxu1 %v194_v1  ;;  %v180_v9 = vld [vmem:[%s798_s24 + $0x40] sm:$0xff]  ;;  %v181_v11 = vld [vmem:[%s798_s24 + $0x48] sm:$0xff]  ;;  %v182_v13 = vld [vmem:[%s798_s24 + $0x50] sm:$0xff]  ;;  %s640_s10 = scalar_lea.vmem %s862_s6, 2048  ;;  %p647_p0 = scmp.lt.s32.totalorder %s862_s6, %s645_s17 }
  0x18   : > { %547 = vmatprep.subr.mxu0 %v193_v2  ;;  %585 = vmatprep.subr.mxu1 %v193_v2  ;;  %v175_v14 = vld [vmem:[%s798_s24 + $0x18] sm:$0xff]  ;;  %v176_v16 = vld [vmem:[%s798_s24 + $0x20] sm:$0xff]  ;;  %v177_v18 = vld [vmem:[%s798_s24 + $0x28] sm:$0xff]  ;;  %p641_p11 = scmp.ne.s32.totalorder %s862_s6, %s640_s10  ;;  %p648_p1 = scmp.lt.s32.totalorder %s646_s19, %s640_s10 }
  0x19   : > { %548 = vmatpush3.msra.mxu0 %v193_v2  ;;  %593 = vmatpush3.msra.mxu1 %v193_v2  ;;  %v183_v15 = vld [vmem:[%s798_s24 + $0x58] sm:$0xff]  ;;  %v184_v17 = vld [vmem:[%s798_s24 + $0x60] sm:$0xff]  ;;  %v185_v19 = vld [vmem:[%s798_s24 + $0x68] sm:$0xff] }
  0x1a   : > { %549 = vmatprep.subr.mxu0 %v192_v3  ;;  %586 = vmatprep.subr.mxu1 %v192_v3  ;;  %v178_v20 = vld [vmem:[%s798_s24 + $0x30] sm:$0xff]  ;;  %v179_v22 = vld [vmem:[%s798_s24 + $0x38] sm:$0xff]  ;;  %v496_v24 = vld [vmem:[%s912_s2] ss:$0 sm:$0xff]  ;;  %p642_p12 = pnand %p641_p11, %p763_p5  ;;  %p649_p2 = por %p648_p1, %p647_p0 }
  0x1b   : > { %550 = vmatpush3.msra.mxu0 %v192_v3  ;;  %594 = vmatpush3.msra.mxu1 %v192_v3  ;;  %v186_v21 = vld [vmem:[%s798_s24 + $0x70] sm:$0xff]  ;;  %v187_v23 = vld [vmem:[%s798_s24 + $0x78] sm:$0xff] }
  0x1c   : > { %551 = vmatprep.subr.mxu0 %v191_v4  ;;  %587 = vmatprep.subr.mxu1 %v191_v4  ;;  %p643_p13 = pneg %p642_p12 }
  0x1d   : > { %552 = vmatpush3.msra.mxu0 %v191_v4  ;;  %595 = vmatpush3.msra.mxu1 %v191_v4 }
  0x1e   : > { %553 = vmatprep.subr.mxu0 %v190_v5  ;;  %588 = vmatprep.subr.mxu1 %v190_v5  ;;  %p650_p3 = pnand %p649_p2, %p643_p13 }
  0x1f   : > { %554 = vmatpush3.msra.mxu0 %v190_v5  ;;  %596 = vmatpush3.msra.mxu1 %v190_v5 }
  0x20   : > { %555 = vmatprep.subr.mxu0 %v189_v6  ;;  %589 = vmatprep.subr.mxu1 %v189_v6 }
  0x21   : > { %556 = vmatpush3.msra.mxu0 %v189_v6  ;;  %597 = vmatpush3.msra.mxu1 %v189_v6 }
  0x22   : > { %557 = vmatprep.subr.mxu0 %v188_v7  ;;  %590 = vmatprep.subr.mxu1 %v188_v7 }
  0x23   : > { %558 = vmatpush3.msra.mxu0 %v188_v7  ;;  %598 = vmatpush3.msra.mxu1 %v188_v7 }
  0x24   : > { %559 = vmatprep.mubr.msk.f32.mxu0 %vm203_vm0, %v172_v8  ;;  %571 = vmatprep.mubr.msk.f32.mxu1 %vm203_vm0, %v180_v9 }
  0x25   : > { %560 = vmatmul.mubr.msk.f32.vlgmr.msra.gmra.mxu0 %vm203_vm0, %v173_v10  ;;  %572 = vmatmul.mubr.msk.f32.vlgmr.msra.gmra.mxu1 %vm203_vm0, %v181_v11 }
  0x26   : > { %562 = vmatprep.mubr.msk.f32.mxu0 %vm203_vm0, %v174_v12  ;;  %574 = vmatprep.mubr.msk.f32.mxu1 %vm203_vm0, %v182_v13 }
  0x29   : > { %563 = vmatmul.mubr.msk.f32.gmra.mxu0 %vm203_vm0, %v175_v14  ;;  %575 = vmatmul.mubr.msk.f32.gmra.mxu1 %vm203_vm0, %v183_v15 }
  0x2a   : > { %565 = vmatprep.mubr.msk.f32.mxu0 %vm203_vm0, %v176_v16  ;;  %577 = vmatprep.mubr.msk.f32.mxu1 %vm203_vm0, %v184_v17 }
  0x2d   : > { %566 = vmatmul.mubr.msk.f32.gmra.mxu0 %vm203_vm0, %v177_v18  ;;  %578 = vmatmul.mubr.msk.f32.gmra.mxu1 %vm203_vm0, %v185_v19 }
  0x2e   : > { %568 = vmatprep.mubr.msk.f32.mxu0 %vm203_vm0, %v178_v20  ;;  %580 = vmatprep.mubr.msk.f32.mxu1 %vm203_vm0, %v186_v21 }
  0x31   : > { %569 = vmatmul.mubr.msk.f32.gmra.mxu0 %vm203_vm0, %v179_v22  ;;  %581 = vmatmul.mubr.msk.f32.gmra.mxu1 %vm203_vm0, %v187_v23 }
  0xe5   : > { %v561_v25 = vpop.f32.mrf.mxu0  ;;  %v573_v26 = vpop.f32.mrf.mxu1 }
  0xe6   : > { %v324_v27 = vadd.f32 %v561_v25, %v496_v24  ;;  %v364_v28 = vadd.f32 %v573_v26, %v496_v24 }
  0xe7   : > { %v318_v29 = vpop.f32.mrf.mxu0  ;;  %v358_v30 = vpop.f32.mrf.mxu1 }
  0xe8   : > { %398 = vst [vmem:[%s841_s4 + $0x8] sm:$0xff] %v324_v27  ;;  %406 = vst [vmem:[%s841_s4 + $0x48] sm:$0xff] %v364_v28  ;;  %v319_v31 = vadd.f32 %v496_v24, %v318_v29  ;;  %v359_v32 = vadd.f32 %v496_v24, %v358_v30 }
  0xe9   : > { %v564_v33 = vpop.f32.mrf.mxu0  ;;  %v576_v34 = vpop.f32.mrf.mxu1 }
  0xea   : > { %397 = vst [vmem:[%s841_s4] sm:$0xff] %v319_v31  ;;  %405 = vst [vmem:[%s841_s4 + $0x40] sm:$0xff] %v359_v32  ;;  %v334_v35 = vadd.f32 %v564_v33, %v496_v24  ;;  %v374_v36 = vadd.f32 %v576_v34, %v496_v24 }
  0xeb   : > { %v328_v37 = vpop.f32.mrf.mxu0  ;;  %v368_v38 = vpop.f32.mrf.mxu1 }
  0xec   : > { %400 = vst [vmem:[%s841_s4 + $0x18] sm:$0xff] %v334_v35  ;;  %408 = vst [vmem:[%s841_s4 + $0x58] sm:$0xff] %v374_v36  ;;  %v329_v39 = vadd.f32 %v496_v24, %v328_v37  ;;  %v369_v40 = vadd.f32 %v496_v24, %v368_v38 }
  0xed   : > { %v567_v41 = vpop.f32.mrf.mxu0  ;;  %v579_v42 = vpop.f32.mrf.mxu1 }
  0xee   : > { %399 = vst [vmem:[%s841_s4 + $0x10] sm:$0xff] %v329_v39  ;;  %407 = vst [vmem:[%s841_s4 + $0x50] sm:$0xff] %v369_v40  ;;  %v344_v43 = vadd.f32 %v567_v41, %v496_v24  ;;  %v384_v44 = vadd.f32 %v579_v42, %v496_v24 }
  0xef   : > { %v338_v45 = vpop.f32.mrf.mxu0  ;;  %v378_v46 = vpop.f32.mrf.mxu1 }
  0xf0   : > { %402 = vst [vmem:[%s841_s4 + $0x28] sm:$0xff] %v344_v43  ;;  %410 = vst [vmem:[%s841_s4 + $0x68] sm:$0xff] %v384_v44  ;;  %v339_v47 = vadd.f32 %v496_v24, %v338_v45  ;;  %v379_v48 = vadd.f32 %v496_v24, %v378_v46 }
  0xf1   : > { %v570_v49 = vpop.f32.mrf.mxu0  ;;  %v582_v50 = vpop.f32.mrf.mxu1 }
  0xf2   : > { %401 = vst [vmem:[%s841_s4 + $0x20] sm:$0xff] %v339_v47  ;;  %409 = vst [vmem:[%s841_s4 + $0x60] sm:$0xff] %v379_v48  ;;  %v354_v51 = vadd.f32 %v570_v49, %v496_v24  ;;  %v394_v52 = vadd.f32 %v582_v50, %v496_v24 }
  0xf3   : > { %v348_v53 = vpop.f32.mrf.mxu0  ;;  %v388_v54 = vpop.f32.mrf.mxu1 }
  0xf4   : > { %404 = vst [vmem:[%s841_s4 + $0x38] sm:$0xff] %v354_v51  ;;  %412 = vst [vmem:[%s841_s4 + $0x78] sm:$0xff] %v394_v52  ;;  %v349_v55 = vadd.f32 %v496_v24, %v348_v53  ;;  %v389_v56 = vadd.f32 %v496_v24, %v388_v54 }
  0xf6   : > { %403 = vst [vmem:[%s841_s4 + $0x30] sm:$0xff] %v349_v55  ;;  %411 = vst [vmem:[%s841_s4 + $0x70] sm:$0xff] %v389_v56 }
  0xf7   : > { %653 = shalt.err (!%p650_p3)
}
  0xf8   : > { %s654_s20 = scalar_lea.hbm %s860_s9, 2048  ;;  %s658_s26 = scalar_lea.hbm %s913_s3, 4096 }
  0xf9   : > { %p655_p4 = scmp.ne.s32.totalorder %s860_s9, %s654_s20  ;;  %p659_p9 = scmp.lt.s32.totalorder %s860_s9, %s913_s3 }
  0xfa   : > { %p660_p10 = scmp.lt.s32.totalorder %s658_s26, %s654_s20 }
  0xfb   : > { %p656_p7 = pnand %p655_p4, %p763_p5 }
  0xfc   : > { %p661_p11 = por %p660_p10, %p659_p9 }
  0xfd   : > { %p657_p8 = pneg %p656_p7 }
  0xff   : > { %p662_p12 = pnand %p661_p11, %p657_p8 }
 0x101   : > { %665 = shalt.err (!%p662_p12)
}
 0x102   : > { %s703_s29 = smov 128   ;;  %s704_s30 = smov 8  }
 0x103   : > { %599 = dma.vmem_to_hbm [thread:$0]  (%p763_p5), %s862_s6, 2048, %s860_s9, %s870_s16, %s703_s29, %s703_s29, %s704_s30  }
 0x104 PF: > { %p605_p13 = scmp.ge.s32.totalorder %s700_s15, 2  ;;  %s442_s4 = sand.u32 1, %s688_s12  }
 0x105   : > { %s443_s5 = scalar_lea.sflag [#allocation3], %s442_s4 }
 0x106   : > { %p602_p0 = pnand %p605_p13, %p767_p6 }
 0x108   : > { %p603_p1 = pneg %p602_p0 }
 0x10a   : > { %683 = dma.done.wait (%p603_p1), %s443_s5, 2048  }
 0x10b   : > { %685 = vsyncadd (%p603_p1), %s443_s5, 4294965248  ;;  %p13_p2 = scmp.ge.s32.totalorder %s750_s18, 4   ;;  %s916_s12 = smov %s692_s13 }
 0x10c   : > { %s917_s13 = smov %s696_s14  ;;  %s918_s14 = smov %s761_s21 }
 0x10d   : > { %s919_s15 = smov %s750_s18  ;;  %15 = sbr.rel (!%p13_p2) target bundleno = 3 (0x3), region = 67 }
 0x112   :  { %448 = vsyncpa [#allocation3], 1 }
 0x113   :  { %450 = vsyncpa [#allocation3 + $0x1], 1 }

</bundles_post_ra>
